<compile_context>
chip_gen: v7x
topology: tpu7x:2x2x1
jax: 0.10.0
libtpu: 0.0.40
codegen_flags: <defaults>
</compile_context>

<pallas_src>
import functools

import jax
import jax.numpy as jnp
import numpy as np
from jax.experimental import pallas as pl
from jax.experimental.pallas import tpu as pltpu

LN_EPS = 1e-5  # torch.nn.LayerNorm default eps


# ----------------------------- in-kernel math helpers -----------------------------
def _layernorm(x, gamma, beta):
    # stats kept in float32
    mu = jnp.mean(x, axis=-1, keepdims=True)
    var = jnp.mean((x - mu) ** 2, axis=-1, keepdims=True)
    return (x - mu) * jax.lax.rsqrt(var + LN_EPS) * gamma + beta


def _gelu_tanh(x):
    # tanh-approx GELU (EUP-friendly); error vs exact erf GELU << test tolerance
    c = 0.7978845608028654  # sqrt(2/pi)
    return 0.5 * x * (1.0 + jnp.tanh(c * (x + 0.044715 * x * x * x)))


# ----------------------------------- kernels ---------------------------------------
def _linear_kernel(x_ref, w_ref, b_ref, o_ref):
    # bf16 operands, f32 accumulate
    o_ref[...] = (
        jnp.dot(x_ref[...], w_ref[...], preferred_element_type=jnp.float32)
        + b_ref[...]
    )


def _encoder_kernel(
    x_ref, ln1g, ln1b, wq, wk, wv, wo, bo, ln2g, ln2b, w1, b1, w2, b2, o_ref,
    *, heads, n_valid,
):
    # grid = (batch, depth); this instance: one batch element, one layer.
    layer = pl.program_id(1)

    # Layer 0: load the embedded tokens into the resident output block.
    @pl.when(layer == 0)
    def _():
        o_ref[...] = x_ref[...]

    x = o_ref[0]                       # (Np, D) float32 residual stream (VMEM-resident)
    n_pad = x.shape[0]

    # key-padding mask bias: pad key columns -> -inf before softmax
    col = jax.lax.broadcasted_iota(jnp.int32, (1, n_pad), 1)
    key_bias = jnp.where(col < n_valid, 0.0, -1e30)

    # --- PreNorm + multi-head self-attention --------------------------------
    xn = _layernorm(x, ln1g[...], ln1b[...])          # f32
    xnb = xn.astype(jnp.bfloat16)

    attn_out = bo[...]                                # (1, D) f32, broadcasts over rows
    for h in range(heads):                            # static unrolled loop over heads
        # head-major weights: leading-axis index, no lane slicing
        qh = jnp.dot(xnb, wq[0, h], preferred_element_type=jnp.float32)  # scale folded in wq
        kh = jnp.dot(xnb, wk[0, h], preferred_element_type=jnp.float32)
        vh = jnp.dot(xnb, wv[0, h], preferred_element_type=jnp.float32)
        dots = jax.lax.dot_general(                   # (Np, Np) f32
            qh.astype(jnp.bfloat16), kh.astype(jnp.bfloat16),
            (((1,), (1,)), ((), ())),
            preferred_element_type=jnp.float32,
        )
        dots = dots + key_bias
        dots = dots - jnp.max(dots, axis=-1, keepdims=True)
        e = jnp.exp(dots)
        p = e * pl.reciprocal(jnp.sum(e, axis=-1, keepdims=True), approx=True)
        oh = jnp.dot(p.astype(jnp.bfloat16), vh.astype(jnp.bfloat16),
                     preferred_element_type=jnp.float32)                 # (Np, dh)
        # concat-over-heads followed by Wo == sum of per-head partial matmuls
        attn_out = attn_out + jnp.dot(oh.astype(jnp.bfloat16), wo[0, h],
                                      preferred_element_type=jnp.float32)
    x = x + attn_out

    # --- PreNorm + MLP -------------------------------------------------------
    xn = _layernorm(x, ln2g[...], ln2b[...])
    h1 = jnp.dot(xn.astype(jnp.bfloat16), w1[0],
                 preferred_element_type=jnp.float32) + b1[...]
    h1 = _gelu_tanh(h1)
    h2 = jnp.dot(h1.astype(jnp.bfloat16), w2[0],
                 preferred_element_type=jnp.float32) + b2[...]
    o_ref[0] = x + h2


def _head_kernel(x_ref, g_ref, b_ref, w_ref, bias_ref, o_ref):
    xn = _layernorm(x_ref[...], g_ref[...], b_ref[...])
    o_ref[...] = (
        jnp.dot(xn, w_ref[...], preferred_element_type=jnp.float32) + bias_ref[...]
    )


# -------------------------------- pallas wrappers ----------------------------------
def _full_spec(shape):
    nd = len(shape)
    return pl.BlockSpec(shape, lambda *_, nd=nd: (0,) * nd)


def _layer_spec(arr):
    # whole per-layer block, indexed by the layer grid axis
    nd = arr.ndim
    return pl.BlockSpec(
        (1,) + tuple(arr.shape[1:]),
        lambda ib, l, nd=nd: (l,) + (0,) * (nd - 1),
    )


def vit_forward(img, params, *, patch_size, heads, dim_head):
    b, c, H, W = img.shape
    p = patch_size
    nh, nw = H // p, W // p
    n = nh * nw
    patch_dim = c * p * p
    dim = params["w_patch"].shape[1]
    num_classes = params["w_head"].shape[1]
    depth = len(params["layers"])
    inner = heads * dim_head
    scale = float(dim_head) ** -0.5
    bf16 = jnp.bfloat16

    # einops: 'b c (h p1) (w p2) -> b (h w) (p1 p2 c)'
    patches = img.reshape(b, c, nh, p, nw, p)
    patches = patches.transpose(0, 2, 4, 3, 5, 1).reshape(b, n, patch_dim)

    # ---- patch embedding (Linear) in Pallas, bf16 operands, M-tiled ----
    rows = b * n
    xflat = patches.reshape(rows, patch_dim).astype(bf16)
    w_patch = params["w_patch"].astype(bf16)
    tm = 512 if rows % 512 == 0 else (128 if rows % 128 == 0 else rows)
    emb = pl.pallas_call(
        _linear_kernel,
        out_shape=jax.ShapeDtypeStruct((rows, dim), jnp.float32),
        grid=(rows // tm,),
        in_specs=[
            pl.BlockSpec((tm, patch_dim), lambda i: (i, 0)),
            _full_spec(w_patch.shape),
            _full_spec(params["b_patch"].shape),
        ],
        out_specs=pl.BlockSpec((tm, dim), lambda i: (i, 0)),
        compiler_params=pltpu.CompilerParams(dimension_semantics=("parallel",)),
    )(xflat, w_patch, params["b_patch"])
    x = emb.reshape(b, n, dim)

    # ---- cls token + positional embedding (glue) ----
    cls = jnp.broadcast_to(params["cls_token"], (b, 1, dim))
    x = jnp.concatenate([cls, x], axis=1)
    x = x + params["pos_embedding"][:, : n + 1]
    N = n + 1
    # emb_dropout / dropout are identity (p=0.0 / eval mode)

    # pad token dim to a sublane multiple of 8 (padded keys masked in-kernel)
    Np = ((N + 7) // 8) * 8
    if Np != N:
        x = jnp.pad(x, ((0, 0), (0, Np - N), (0, 0)))

    # ---- stack per-layer weights along a leading depth axis (layout glue) ----
    layers = params["layers"]
    wq_l, wk_l, wv_l, wo_l = [], [], [], []
    for L in layers:
        wqkv = L["wqkv"]
        # head-major: (heads, dim, dim_head); attention scale folded into Wq
        wq_l.append(wqkv[:, :inner].reshape(dim, heads, dim_head).transpose(1, 0, 2) * scale)
        wk_l.append(wqkv[:, inner:2 * inner].reshape(dim, heads, dim_head).transpose(1, 0, 2))
        wv_l.append(wqkv[:, 2 * inner:].reshape(dim, heads, dim_head).transpose(1, 0, 2))
        wo_l.append(L["wo"].reshape(heads, dim_head, dim))

    wq_s = jnp.stack(wq_l).astype(bf16)                         # (depth, H, D, dh)
    wk_s = jnp.stack(wk_l).astype(bf16)
    wv_s = jnp.stack(wv_l).astype(bf16)
    wo_s = jnp.stack(wo_l).astype(bf16)                         # (depth, H, dh, D)
    w1_s = jnp.stack([L["w1"] for L in layers]).astype(bf16)    # (depth, D, mlp)
    w2_s = jnp.stack([L["w2"] for L in layers]).astype(bf16)    # (depth, mlp, D)
    ln1g_s = jnp.concatenate([L["ln1_g"] for L in layers], 0)   # (depth, D) f32
    ln1b_s = jnp.concatenate([L["ln1_b"] for L in layers], 0)
    ln2g_s = jnp.concatenate([L["ln2_g"] for L in layers], 0)
    ln2b_s = jnp.concatenate([L["ln2_b"] for L in layers], 0)
    bo_s = jnp.concatenate([L["bo"] for L in layers], 0)        # (depth, D)
    b1_s = jnp.concatenate([L["b1"] for L in layers], 0)        # (depth, mlp)
    b2_s = jnp.concatenate([L["b2"] for L in layers], 0)        # (depth, D)

    weight_arrays = (ln1g_s, ln1b_s, wq_s, wk_s, wv_s, wo_s, bo_s,
                     ln2g_s, ln2b_s, w1_s, b1_s, w2_s, b2_s)

    x_spec = pl.BlockSpec((1, Np, dim), lambda ib, l: (ib, 0, 0))

    # ---- ALL transformer layers in ONE pallas_call ----
    kern = functools.partial(_encoder_kernel, heads=heads, n_valid=N)
    x = pl.pallas_call(
        kern,
        out_shape=jax.ShapeDtypeStruct((b, Np, dim), jnp.float32),
        grid=(b, depth),
        in_specs=[x_spec] + [_layer_spec(w) for w in weight_arrays],
        out_specs=x_spec,  # same block across the layer axis -> VMEM-resident residual
        compiler_params=pltpu.CompilerParams(
            dimension_semantics=("parallel", "arbitrary"),
            vmem_limit_bytes=32 * 1024 * 1024,
        ),
    )(x, *weight_arrays)

    # ---- pool == 'cls' + mlp head ----
    pooled = x[:, 0]
    logits = pl.pallas_call(
        _head_kernel,
        out_shape=jax.ShapeDtypeStruct((b, num_classes), jnp.float32),
        grid=(1,),
        in_specs=[
            _full_spec(pooled.shape),
            _full_spec(params["lnh_g"].shape),
            _full_spec(params["lnh_b"].shape),
            _full_spec(params["w_head"].shape),
            _full_spec(params["b_head"].shape),
        ],
        out_specs=_full_spec((b, num_classes)),
    )(pooled, params["lnh_g"], params["lnh_b"], params["w_head"], params["b_head"])
    return logits


# ------------------------------- parameter init ------------------------------------
def init_params(key, *, image_size, patch_size, channels, dim, depth, heads, dim_head,
                mlp_dim, num_classes):
    p = patch_size
    n = (image_size // p) * (image_size // p)
    patch_dim = channels * p * p
    inner = heads * dim_head
    keys = jax.random.split(key, 4 + depth)

    def rnd(k, shape, s=0.02):
        return (s * jax.random.normal(k, shape)).astype(jnp.float32)

    params = {
        "w_patch": rnd(keys[0], (patch_dim, dim)),
        "b_patch": jnp.zeros((1, dim), jnp.float32),
        "pos_embedding": jax.random.normal(keys[1], (1, n + 1, dim), jnp.float32),
        "cls_token": jax.random.normal(keys[2], (1, 1, dim), jnp.float32),
        "lnh_g": jnp.ones((1, dim), jnp.float32),
        "lnh_b": jnp.zeros((1, dim), jnp.float32),
        "w_head": rnd(keys[3], (dim, num_classes)),
        "b_head": jnp.zeros((1, num_classes), jnp.float32),
        "layers": [],
    }
    for d in range(depth):
        lk = jax.random.split(keys[4 + d], 4)
        params["layers"].append(
            {
                "ln1_g": jnp.ones((1, dim), jnp.float32),
                "ln1_b": jnp.zeros((1, dim), jnp.float32),
                "wqkv": rnd(lk[0], (dim, 3 * inner)),
                "wo": rnd(lk[1], (inner, dim)),
                "bo": jnp.zeros((1, dim), jnp.float32),
                "ln2_g": jnp.ones((1, dim), jnp.float32),
                "ln2_b": jnp.zeros((1, dim), jnp.float32),
                "w1": rnd(lk[2], (dim, mlp_dim)),
                "b1": jnp.zeros((1, mlp_dim), jnp.float32),
                "w2": rnd(lk[3], (mlp_dim, dim)),
                "b2": jnp.zeros((1, dim), jnp.float32),
            }
        )
    return params


# ------------------------------ pure-JAX reference ----------------------------------
def _ref_layernorm(x, g, b):
    mu = x.mean(-1, keepdims=True)
    var = ((x - mu) ** 2).mean(-1, keepdims=True)
    return (x - mu) / jnp.sqrt(var + LN_EPS) * g + b


def vit_reference(img, params, *, patch_size, heads, dim_head):
    from jax.scipy.special import erf

    b, c, H, W = img.shape
    p = patch_size
    nh, nw = H // p, W // p
    n = nh * nw
    patches = img.reshape(b, c, nh, p, nw, p).transpose(0, 2, 4, 3, 5, 1).reshape(b, n, -1)
    x = patches @ params["w_patch"] + params["b_patch"]
    dim = x.shape[-1]
    cls = jnp.broadcast_to(params["cls_token"], (b, 1, dim))
    x = jnp.concatenate([cls, x], 1) + params["pos_embedding"][:, : n + 1]
    scale = float(dim_head) ** -0.5
    inner = heads * dim_head
    for L in params["layers"]:
        xn = _ref_layernorm(x, L["ln1_g"], L["ln1_b"])
        qkv = xn @ L["wqkv"]
        q, k, v = jnp.split(qkv, 3, axis=-1)
        hv = lambda t: t.reshape(b, -1, heads, dim_head).transpose(0, 2, 1, 3)
        q, k, v = hv(q), hv(k), hv(v)
        dots = jnp.einsum("bhid,bhjd->bhij", q, k) * scale
        attn = jax.nn.softmax(dots, axis=-1)
        out = jnp.einsum("bhij,bhjd->bhid", attn, v)
        out = out.transpose(0, 2, 1, 3).reshape(b, -1, inner)
        x = x + (out @ L["wo"] + L["bo"])
        xn = _ref_layernorm(x, L["ln2_g"], L["ln2_b"])
        h1 = xn @ L["w1"] + L["b1"]
        h1 = 0.5 * h1 * (1.0 + erf(h1 * 0.7071067811865476))
        x = x + (h1 @ L["w2"] + L["b2"])
    pooled = x[:, 0]
    xn = _ref_layernorm(pooled, params["lnh_g"], params["lnh_b"])
    return xn @ params["w_head"] + params["b_head"]


# --------------------------------------- main ---------------------------------------
if __name__ == "__main__":
    cfg = dict(
        image_size=16, patch_size=4, channels=1, dim=32, depth=2, heads=2,
        dim_head=16, mlp_dim=64, num_classes=10,
    )
    key = jax.random.PRNGKey(0)
    pkey, xkey = jax.random.split(key)
    params = init_params(pkey, **cfg)
    img = jax.random.normal(
        xkey, (2, cfg["channels"], cfg["image_size"], cfg["image_size"]), jnp.float32
    )

    out = vit_forward(
        img, params, patch_size=cfg["patch_size"], heads=cfg["heads"], dim_head=cfg["dim_head"]
    )
    out = jax.block_until_ready(out)
    assert out.shape == (2, cfg["num_classes"])

    ref = vit_reference(
        img, params, patch_size=cfg["patch_size"], heads=cfg["heads"], dim_head=cfg["dim_head"]
    )
    np.testing.assert_allclose(np.asarray(out), np.asarray(ref), rtol=5e-2, atol=5e-3)
    print("KERNEL_OK")
</pallas_src>

<mosaic_0001>
module attributes {stable_mosaic.version = 11 : i64} {
  func.func @_linear_kernel(%arg0: i32, %arg1: memref<32x16xbf16, #tpu.memory_space<vmem>>, %arg2: memref<16x32xbf16, #tpu.memory_space<vmem>>, %arg3: memref<1x32xf32, #tpu.memory_space<vmem>>, %arg4: memref<32x32xf32, #tpu.memory_space<vmem>>) attributes {dimension_semantics = [#tpu.dimension_semantics<parallel>], iteration_bounds = array<i64: 1>, scalar_prefetch = 0 : i64, scratch_operands = 0 : i64, tpu.core_type = #tpu.core_type<tc>, window_params = [{transform_indices = @transform_0, window_bounds = array<i64: 32, 16>}, {pipeline_mode = #tpu.pipeline_mode<synchronous>, transform_indices = @transform_1, window_bounds = array<i64: 16, 32>}, {pipeline_mode = #tpu.pipeline_mode<synchronous>, transform_indices = @transform_2, window_bounds = array<i64: 1, 32>}, {transform_indices = @transform_3, window_bounds = array<i64: 32, 32>}]} {
    %c0 = arith.constant 0 : index
    %c0_0 = arith.constant 0 : index
    %0 = vector.load %arg1[%c0, %c0_0] : memref<32x16xbf16, #tpu.memory_space<vmem>>, vector<32x16xbf16>
    %c0_1 = arith.constant 0 : index
    %c0_2 = arith.constant 0 : index
    %1 = vector.load %arg2[%c0_1, %c0_2] : memref<16x32xbf16, #tpu.memory_space<vmem>>, vector<16x32xbf16>
    %cst = arith.constant dense<0.000000e+00> : vector<32x32xf32>
    %2 = tpu.matmul %0, %1, %cst {dimension_numbers = #tpu.dot_dimension_numbers<[1], [0], [0], [1], [0, 0, 1, 1], [], []>} : vector<32x16xbf16>, vector<16x32xbf16>, vector<32x32xf32> -> vector<32x32xf32>
    %c0_3 = arith.constant 0 : index
    %c0_4 = arith.constant 0 : index
    %3 = vector.load %arg3[%c0_3, %c0_4] : memref<1x32xf32, #tpu.memory_space<vmem>>, vector<1x32xf32>
    %4 = vector.broadcast %3 : vector<1x32xf32> to vector<32x32xf32>
    %5 = arith.addf %2, %4 : vector<32x32xf32>
    %c0_5 = arith.constant 0 : index
    %c0_6 = arith.constant 0 : index
    %6 = vector.load %arg4[%c0_5, %c0_6] : memref<32x32xf32, #tpu.memory_space<vmem>>, vector<32x32xf32>
    tpu.vector_store %arg4[%c0_5, %c0_6], %5 {strides = array<i32>} : memref<32x32xf32, #tpu.memory_space<vmem>>, vector<32x32xf32>,
    return
  }
  func.func @transform_0(%arg0: i32) -> (i32, i32) {
    %c0_i32 = arith.constant 0 : i32
    %c0_i32_0 = arith.constant 0 : i32
    return %arg0, %c0_i32 : i32, i32
  }
  func.func @transform_1(%arg0: i32) -> (i32, i32) {
    %c0_i32 = arith.constant 0 : i32
    %c0_i32_0 = arith.constant 0 : i32
    %c0_i32_1 = arith.constant 0 : i32
    return %c0_i32, %c0_i32_0 : i32, i32
  }
  func.func @transform_2(%arg0: i32) -> (i32, i32) {
    %c0_i32 = arith.constant 0 : i32
    %c0_i32_0 = arith.constant 0 : i32
    %c0_i32_1 = arith.constant 0 : i32
    return %c0_i32, %c0_i32_0 : i32, i32
  }
  func.func @transform_3(%arg0: i32) -> (i32, i32) {
    %c0_i32 = arith.constant 0 : i32
    %c0_i32_0 = arith.constant 0 : i32
    return %arg0, %c0_i32 : i32, i32
  }
}

</mosaic_0001>

<bundles_post_ra>
// kernel: tpu_custom_call.1
= control target key start
LH: loop header
LB: loop body
LE: loop exit
PB: predicated region body
PF: predicated region fallthrough
CT: control target
= control target key end

     0   :  { %vm45_vm0 = vcmask 130048   ;;  %s214_s0 = inlined_call_operand.vmem [shape: bf16[32,16], index: 0, kind: input, shape index: {}]   ;;  %s215_s1 = inlined_call_operand.vmem [shape: bf16[16,32], index: 1, kind: input, shape index: {}]   ;;  %s216_s2 = inlined_call_operand.vmem [shape: f32[1,32], index: 2, kind: input, shape index: {}]   ;;  %s217_s3 = inlined_call_operand.hbm [shape: f32[32,32], index: 3, kind: output, shape index: {}]  }
   0x1   :  { %v140_v0 = vld [vmem:[%s215_s1] sm:$0xff]   ;;  %v142_v2 = vld [vmem:[%s214_s0 + $0x8] sm:$0xff]  }
   0x2   :  { %v141_v1 = vld [vmem:[%s214_s0] sm:$0xff]   ;;  %131 = vmatprep.subr.bf16.mxu0 %v140_v0 }
   0x3   :  { %132 = vmatpush3.bf16.msra.mxu0 %v140_v0  ;;  %133 = vmatprep.mubr.msk.bf16.mxu0 %vm45_vm0, %v141_v1 }
   0x4   :  { %8 = vsyncpa [#allocation3], 0  ;;  %v122_v3 = vld [vmem:[%s216_s2] ss:$0 sm:$0xff]  ;;  %vm101_vm1 = vcmask 261120   ;;  %s167_s1 = smov [#allocation2]  }
   0x5   :  { %s111_s20 = sshll.u32 %s167_s1, 4  ;;  %s112_s20 = int_to_ptr.vmem [resolvable:$true] %s111_s20 }
   0x6   :  { %134 = vmatmul.mubr.msk.bf16.vlgmr.msra.gmra.mrb[0].mxu0 %vm45_vm0, %v142_v2  ;;  %s143_s0 = scalar_lea.vmem %s112_s20, 512  ;;  %p148_p1 = scmp.lt.s32.totalorder %s112_s20, %s112_s20 }
   0x7   :  { %p144_p0 = scmp.ne.s32.totalorder %s112_s20, %s143_s0  ;;  %p149_p2 = scmp.lt.s32.totalorder %s143_s0, %s143_s0 }
   0x9   :  { %p150_p3 = por %p149_p2, %p148_p1 }
   0xb   :  { %p151_p4 = pnand %p150_p3, %p144_p0 }
  0xd9   :  { %v135_v4 = vpop.f32.mrb[0].mxu0 }
  0xda   :  { %v95_v5 = vadd.f32 %v135_v4, %v122_v3  ;;  %v86_v6 = vpop.f32.mrb[1].mxu0 }
  0xdb   :  { %v87_v7 = vadd.f32 %v122_v3, %v86_v6  ;;  %v136_v8 = vpop.f32.mrb[2].mxu0 }
  0xdc   :  { %104 = vst.msk [vmem:[#allocation2 + $0x10] sm:$0xff] %vm101_vm1, %v95_v5  ;;  %v98_v9 = vadd.f32 %v136_v8, %v122_v3  ;;  %v89_v10 = vpop.f32.mrb[3].mxu0 }
  0xdd   :  { %102 = vst.msk [vmem:[#allocation2] sm:$0xff] %vm101_vm1, %v87_v7  ;;  %v90_v11 = vadd.f32 %v122_v3, %v89_v10 }
  0xde   :  { %105 = vst.msk [vmem:[#allocation2 + $0x18] sm:$0xff] %vm101_vm1, %v98_v9 }
  0xdf   :  { %103 = vst.msk [vmem:[#allocation2 + $0x8] sm:$0xff] %vm101_vm1, %v90_v11 }
  0xe0   :  { %154 = shalt.err (!%p151_p4)
}
  0xe1   :  { %s155_s22 = scalar_lea.hbm %s217_s3, 512 }
  0xe2   :  { %p156_p5 = scmp.ne.s32.totalorder %s217_s3, %s155_s22  ;;  %p159_p6 = scmp.lt.u32.totalorder %s155_s22, %s217_s3 }
  0xe4   :  { %p161_p7 = pnand %p159_p6, %p156_p5 }
  0xe6   :  { %164 = shalt.err (!%p161_p7)
}
  0xe7   :  { %s168_s27 = smov 128   ;;  %s169_s28 = smov 8  }
  0xe8   :  { %117 = dma.vmem_to_hbm [thread:$0]  %s112_s20, 512, %s217_s3, [#allocation3], %s168_s27, %s168_s27, %s169_s28  }
  0xe9   :  { %165 = dma.done.wait [#allocation3], 512  }
  0xea   :  { %166 = vsyncadd [#allocation3], 4294966784 }
  0xeb   :  { %121 = vsyncpa [#allocation3], 1 }

</bundles_post_ra>
